<compile_context>
chip_gen: v6e
topology: v6e:2x2x1
jax: 0.10.0
libtpu: 0.0.40
codegen_flags: <defaults>
</compile_context>

<pallas_src>
import functools
import math

import jax
import jax.numpy as jnp
from jax.experimental import pallas as pl
from jax.experimental.pallas import tpu as pltpu


def _round_up(x, m):
    return (x + m - 1) // m * m


def _lstm_stack_kernel(x_ref, w0_ref, wr_ref, b_ref, mask_ref, o_ref,
                       *, num_layers, hidden, act_dtype):
    """Fused forward through the whole LSTM stack for ONE timestep (h0 = c0 = 0)."""
    H = hidden

    def cell(gates_f32):
        # PyTorch gate order: i, f, g, o.  The forget gate multiplies c_0 == 0,
        # so it contributes nothing and is skipped entirely.
        g = gates_f32.astype(act_dtype)
        i_gate = jax.nn.sigmoid(g[:, 0 * H:1 * H])
        g_gate = jnp.tanh(g[:, 2 * H:3 * H])
        o_gate = jax.nn.sigmoid(g[:, 3 * H:4 * H])
        c = i_gate * g_gate
        return (o_gate * jnp.tanh(c)).astype(jnp.float32)

    matmul_dtype = w0_ref.dtype   # weights pre-cast wrapper-side (bf16 or f32)

    # Layer 0: (TB, Fin) @ (Fin, 4H) on the MXU, f32 accumulation.
    gates = jnp.dot(x_ref[...], w0_ref[...],
                    preferred_element_type=jnp.float32) + b_ref[0:1, :]
    h = cell(gates)                                          # (TB, H) f32

    # Layers 1..L-1: static unroll.  Weights / dropout masks are indexed lazily
    # per layer so only one (H, 4H) slab is live at a time (flat vreg pressure).
    for l in range(1, num_layers):
        h_in = (h * mask_ref[l - 1]).astype(matmul_dtype)    # inverted dropout (f32 VPU)
        gates = jnp.dot(h_in, wr_ref[l - 1],
                        preferred_element_type=jnp.float32) + b_ref[l:l + 1, :]
        h = cell(gates)

    o_ref[...] = h.astype(o_ref.dtype)


def make_dropout_masks(key, num_layers, batch, hidden, dropout_p, training):
    """Inverted-dropout masks for outputs of layers 0..L-2 (nn.LSTM semantics)."""
    n_mask = max(num_layers - 1, 1)
    if training and dropout_p > 0.0 and num_layers > 1:
        keep = jax.random.bernoulli(key, 1.0 - dropout_p, (n_mask, batch, hidden))
        return keep.astype(jnp.float32) / (1.0 - dropout_p)
    return jnp.ones((n_mask, batch, hidden), jnp.float32)


def event_lstm_forward(embeddings, params, dropout_masks, *,
                       use_bf16_matmul=True, use_bf16_activations=False):
    """Fused EventLSTM forward: (B, input_size) -> (B, hidden_size[0])."""
    # The single-timestep / zero-state assumption behind the W_hh & forget-gate
    # elision only holds for 2-D inputs (the reference unsqueezes to seq_len=1).
    assert embeddings.ndim == 2, "EventLSTM forward expects (batch, input_size)"

    w0, wr, b = params["w0"], params["wr"], params["b"]
    B, Fin = embeddings.shape
    L, fourH = b.shape
    H = fourH // 4
    n_mask = max(L - 1, 1)

    matmul_dtype = jnp.bfloat16 if use_bf16_matmul else jnp.float32
    # bf16 activations only recommended on v6e/v7x (bf16 EUP); keep f32 on v5e.
    act_dtype = jnp.bfloat16 if use_bf16_activations else jnp.float32

    # Wrapper-side pre-cast: halves weight/input DMA bytes and removes per-step
    # in-kernel cast traffic; MXU still accumulates in f32.
    x = embeddings.astype(matmul_dtype)
    w0 = w0.astype(matmul_dtype)
    wr = wr.astype(matmul_dtype)

    # Batch tiling: pad to a sublane multiple, then run the whole batch in a
    # single grid step when it fits comfortably (B_pad <= 512), otherwise in
    # large 256-row tiles (megacore-shardable via the 'parallel' axis on v7x).
    B_pad = _round_up(B, 8)
    if B_pad <= 512:
        TB = B_pad
    else:
        TB = 256
        B_pad = _round_up(B_pad, TB)
    if B_pad != B:
        x = jnp.pad(x, ((0, B_pad - B), (0, 0)))
        dropout_masks = jnp.pad(dropout_masks, ((0, 0), (0, B_pad - B), (0, 0)))
    grid = (B_pad // TB,)

    # Honest scoped-VMEM budget: double-buffered block bytes + generous headroom.
    def _nbytes(shape, dtype):
        return math.prod(shape) * jnp.dtype(dtype).itemsize
    block_bytes = (_nbytes((TB, Fin), matmul_dtype)
                   + _nbytes((Fin, fourH), matmul_dtype)
                   + _nbytes((n_mask, H, fourH), matmul_dtype)
                   + _nbytes((L, fourH), jnp.float32)
                   + _nbytes((n_mask, TB, H), jnp.float32)
                   + _nbytes((TB, H), jnp.float32))
    vmem_limit = int(2 * block_bytes + (4 << 20))

    kernel = functools.partial(_lstm_stack_kernel, num_layers=L, hidden=H,
                               act_dtype=act_dtype)

    out = pl.pallas_call(
        kernel,
        out_shape=jax.ShapeDtypeStruct((B_pad, H), jnp.float32),
        grid=grid,
        in_specs=[
            pl.BlockSpec((TB, Fin), lambda i: (i, 0)),              # x batch tile
            pl.BlockSpec((Fin, fourH), lambda i: (0, 0)),           # W_ih^T layer 0
            pl.BlockSpec((n_mask, H, fourH), lambda i: (0, 0, 0)),  # W_ih^T layers 1..L-1
            pl.BlockSpec((L, fourH), lambda i: (0, 0)),             # combined biases
            pl.BlockSpec((n_mask, TB, H), lambda i: (0, i, 0)),     # dropout masks
        ],
        out_specs=pl.BlockSpec((TB, H), lambda i: (i, 0)),
        compiler_params=pltpu.CompilerParams(
            dimension_semantics=("parallel",),
            vmem_limit_bytes=vmem_limit,
        ),
    )(x, w0, wr, b, dropout_masks)

    return out[:B]


def init_event_lstm_params(key, input_size, hidden_size):
    """Match nn.LSTM reset_parameters: U(-1/sqrt(H), 1/sqrt(H)) for all params."""
    L = len(hidden_size)
    H = hidden_size[0]
    stdv = 1.0 / math.sqrt(H)
    w0 = None
    wr = []
    biases = []
    fin = input_size
    for l in range(L):
        key, k_wih, k_whh, k_bih, k_bhh = jax.random.split(key, 5)
        w_ih = jax.random.uniform(k_wih, (4 * H, fin), jnp.float32, -stdv, stdv)
        _w_hh = jax.random.uniform(k_whh, (4 * H, H), jnp.float32, -stdv, stdv)
        b_ih = jax.random.uniform(k_bih, (4 * H,), jnp.float32, -stdv, stdv)
        b_hh = jax.random.uniform(k_bhh, (4 * H,), jnp.float32, -stdv, stdv)
        # _w_hh is sampled for parameter-stream fidelity but never used:
        # h_0 == 0 in this forward pass, so W_hh @ h_0 == 0.
        if l == 0:
            w0 = w_ih.T                      # (Fin, 4H): lane-dense gate axis
        else:
            wr.append(w_ih.T)                # (H, 4H)
        biases.append(b_ih + b_hh)
        fin = H
    wr = (jnp.stack(wr, axis=0) if wr
          else jnp.zeros((1, H, 4 * H), jnp.float32))
    b = jnp.stack(biases, axis=0)            # (L, 4H)
    return {"w0": w0, "wr": wr, "b": b}


def _reference_forward(embeddings, params, dropout_masks, *, use_bf16_matmul=True):
    """Pure-JAX reference reproducing the kernel's (pre-cast) numerics."""
    w0, wr, b = params["w0"], params["wr"], params["b"]
    L, fourH = b.shape
    H = fourH // 4
    dt = jnp.bfloat16 if use_bf16_matmul else jnp.float32
    x = embeddings.astype(dt).astype(jnp.float32)
    w0 = w0.astype(dt).astype(jnp.float32)
    wr = wr.astype(dt).astype(jnp.float32)

    def cell(gates):
        i = jax.nn.sigmoid(gates[:, 0 * H:1 * H])
        g = jnp.tanh(gates[:, 2 * H:3 * H])
        o = jax.nn.sigmoid(gates[:, 3 * H:4 * H])
        return o * jnp.tanh(i * g)

    gates = jnp.dot(x, w0, precision=jax.lax.Precision.HIGHEST) + b[0]
    h = cell(gates)
    for l in range(1, L):
        h_in = (h * dropout_masks[l - 1]).astype(dt).astype(jnp.float32)
        gates = jnp.dot(h_in, wr[l - 1],
                        precision=jax.lax.Precision.HIGHEST) + b[l]
        h = cell(gates)
    return h


if __name__ == "__main__":
    key = jax.random.PRNGKey(0)
    batch = 16                    # B_pad = 16 -> single grid step, TB = 16
    input_size = 64
    hidden_size = (128, 128)      # num_layers = 2, embeddings_size = 128
    dropout_p = 0.25

    k_x, k_p, k_d = jax.random.split(key, 3)
    embeddings = jax.random.normal(k_x, (batch, input_size), jnp.float32)
    params = init_event_lstm_params(k_p, input_size, hidden_size)
    masks = make_dropout_masks(k_d, len(hidden_size), batch, hidden_size[0],
                               dropout_p, training=True)

    out = event_lstm_forward(embeddings, params, masks)     # bf16 matmul default
    out = jax.block_until_ready(out)

    assert out.shape == (batch, hidden_size[0])
    assert bool(jnp.all(jnp.isfinite(out)))

    ref = _reference_forward(embeddings, params, masks)
    assert bool(jnp.allclose(out, ref, atol=5e-3, rtol=5e-3)), (
        float(jnp.max(jnp.abs(out - ref))))

    print("KERNEL_OK")
</pallas_src>

<mosaic_0001>
module attributes {stable_mosaic.version = 11 : i64} {
  func.func @_lstm_stack_kernel(%arg0: i32, %arg1: memref<16x64xbf16, #tpu.memory_space<vmem>>, %arg2: memref<64x512xbf16, #tpu.memory_space<vmem>>, %arg3: memref<1x128x512xbf16, #tpu.memory_space<vmem>>, %arg4: memref<2x512xf32, #tpu.memory_space<vmem>>, %arg5: memref<1x16x128xf32, #tpu.memory_space<vmem>>, %arg6: memref<16x128xf32, #tpu.memory_space<vmem>>) attributes {dimension_semantics = [#tpu.dimension_semantics<parallel>], iteration_bounds = array<i64: 1>, scalar_prefetch = 0 : i64, scratch_operands = 0 : i64, tpu.core_type = #tpu.core_type<tc>, window_params = [{transform_indices = @transform_0, window_bounds = array<i64: 16, 64>}, {pipeline_mode = #tpu.pipeline_mode<synchronous>, transform_indices = @transform_1, window_bounds = array<i64: 64, 512>}, {pipeline_mode = #tpu.pipeline_mode<synchronous>, transform_indices = @transform_2, window_bounds = array<i64: 1, 128, 512>}, {pipeline_mode = #tpu.pipeline_mode<synchronous>, transform_indices = @transform_3, window_bounds = array<i64: 2, 512>}, {transform_indices = @transform_4, window_bounds = array<i64: 1, 16, 128>}, {transform_indices = @transform_5, window_bounds = array<i64: 16, 128>}]} {
    %c0 = arith.constant 0 : index
    %c0_0 = arith.constant 0 : index
    %0 = vector.load %arg1[%c0, %c0_0] : memref<16x64xbf16, #tpu.memory_space<vmem>>, vector<16x64xbf16>
    %c0_1 = arith.constant 0 : index
    %c0_2 = arith.constant 0 : index
    %1 = vector.load %arg2[%c0_1, %c0_2] : memref<64x512xbf16, #tpu.memory_space<vmem>>, vector<64x512xbf16>
    %cst = arith.constant dense<0.000000e+00> : vector<16x512xf32>
    %2 = tpu.matmul %0, %1, %cst {dimension_numbers = #tpu.dot_dimension_numbers<[1], [0], [0], [1], [0, 0, 1, 1], [], []>} : vector<16x64xbf16>, vector<64x512xbf16>, vector<16x512xf32> -> vector<16x512xf32>
    %c0_3 = arith.constant 0 : index
    %c0_4 = arith.constant 0 : index
    %3 = vector.load %arg4[%c0_3, %c0_4] : memref<2x512xf32, #tpu.memory_space<vmem>>, vector<1x512xf32>
    %4 = vector.broadcast %3 : vector<1x512xf32> to vector<16x512xf32>
    %5 = arith.addf %2, %4 : vector<16x512xf32>
    %6 = vector.extract_strided_slice %5 {offsets = [0, 0], sizes = [16, 128], strides = [1, 1]} : vector<16x512xf32> to vector<16x128xf32>
    %7 = arith.negf %6 : vector<16x128xf32>
    %8 = math.exp %7 : vector<16x128xf32>
    %cst_5 = arith.constant 1.000000e+00 : f32
    %9 = vector.broadcast %cst_5 : f32 to vector<16x128xf32>
    %10 = arith.addf %9, %8 : vector<16x128xf32>
    %11 = arith.divf %9, %10 : vector<16x128xf32>
    %12 = vector.extract_strided_slice %5 {offsets = [0, 256], sizes = [16, 128], strides = [1, 1]} : vector<16x512xf32> to vector<16x128xf32>
    %13 = math.tanh %12 : vector<16x128xf32>
    %14 = vector.extract_strided_slice %5 {offsets = [0, 384], sizes = [16, 128], strides = [1, 1]} : vector<16x512xf32> to vector<16x128xf32>
    %15 = arith.negf %14 : vector<16x128xf32>
    %16 = math.exp %15 : vector<16x128xf32>
    %cst_6 = arith.constant 1.000000e+00 : f32
    %17 = vector.broadcast %cst_6 : f32 to vector<16x128xf32>
    %18 = arith.addf %17, %16 : vector<16x128xf32>
    %19 = arith.divf %17, %18 : vector<16x128xf32>
    %20 = arith.mulf %11, %13 : vector<16x128xf32>
    %21 = math.tanh %20 : vector<16x128xf32>
    %22 = arith.mulf %19, %21 : vector<16x128xf32>
    %c0_7 = arith.constant 0 : index
    %c0_8 = arith.constant 0 : index
    %c0_9 = arith.constant 0 : index
    %23 = vector.load %arg5[%c0_7, %c0_8, %c0_9] : memref<1x16x128xf32, #tpu.memory_space<vmem>>, vector<1x16x128xf32>
    %24 = vector.shape_cast %23 : vector<1x16x128xf32> to vector<16x128xf32>
    %25 = arith.mulf %22, %24 : vector<16x128xf32>
    %26 = arith.truncf %25 : vector<16x128xf32> to vector<16x128xbf16>
    %c0_10 = arith.constant 0 : index
    %c0_11 = arith.constant 0 : index
    %c0_12 = arith.constant 0 : index
    %27 = vector.load %arg3[%c0_10, %c0_11, %c0_12] : memref<1x128x512xbf16, #tpu.memory_space<vmem>>, vector<1x128x512xbf16>
    %28 = vector.shape_cast %27 : vector<1x128x512xbf16> to vector<128x512xbf16>
    %cst_13 = arith.constant dense<0.000000e+00> : vector<16x512xf32>
    %29 = tpu.matmul %26, %28, %cst_13 {dimension_numbers = #tpu.dot_dimension_numbers<[1], [0], [0], [1], [0, 0, 1, 1], [], []>} : vector<16x128xbf16>, vector<128x512xbf16>, vector<16x512xf32> -> vector<16x512xf32>
    %c1 = arith.constant 1 : index
    %c0_14 = arith.constant 0 : index
    %30 = vector.load %arg4[%c1, %c0_14] : memref<2x512xf32, #tpu.memory_space<vmem>>, vector<1x512xf32>
    %31 = vector.broadcast %30 : vector<1x512xf32> to vector<16x512xf32>
    %32 = arith.addf %29, %31 : vector<16x512xf32>
    %33 = vector.extract_strided_slice %32 {offsets = [0, 0], sizes = [16, 128], strides = [1, 1]} : vector<16x512xf32> to vector<16x128xf32>
    %34 = arith.negf %33 : vector<16x128xf32>
    %35 = math.exp %34 : vector<16x128xf32>
    %cst_15 = arith.constant 1.000000e+00 : f32
    %36 = vector.broadcast %cst_15 : f32 to vector<16x128xf32>
    %37 = arith.addf %36, %35 : vector<16x128xf32>
    %38 = arith.divf %36, %37 : vector<16x128xf32>
    %39 = vector.extract_strided_slice %32 {offsets = [0, 256], sizes = [16, 128], strides = [1, 1]} : vector<16x512xf32> to vector<16x128xf32>
    %40 = math.tanh %39 : vector<16x128xf32>
    %41 = vector.extract_strided_slice %32 {offsets = [0, 384], sizes = [16, 128], strides = [1, 1]} : vector<16x512xf32> to vector<16x128xf32>
    %42 = arith.negf %41 : vector<16x128xf32>
    %43 = math.exp %42 : vector<16x128xf32>
    %cst_16 = arith.constant 1.000000e+00 : f32
    %44 = vector.broadcast %cst_16 : f32 to vector<16x128xf32>
    %45 = arith.addf %44, %43 : vector<16x128xf32>
    %46 = arith.divf %44, %45 : vector<16x128xf32>
    %47 = arith.mulf %38, %40 : vector<16x128xf32>
    %48 = math.tanh %47 : vector<16x128xf32>
    %49 = arith.mulf %46, %48 : vector<16x128xf32>
    %c0_17 = arith.constant 0 : index
    %c0_18 = arith.constant 0 : index
    %50 = vector.load %arg6[%c0_17, %c0_18] : memref<16x128xf32, #tpu.memory_space<vmem>>, vector<16x128xf32>
    tpu.vector_store %arg6[%c0_17, %c0_18], %49 {strides = array<i32>} : memref<16x128xf32, #tpu.memory_space<vmem>>, vector<16x128xf32>,
    return
  }
  func.func @transform_0(%arg0: i32) -> (i32, i32) {
    %c0_i32 = arith.constant 0 : i32
    %c0_i32_0 = arith.constant 0 : i32
    return %arg0, %c0_i32 : i32, i32
  }
  func.func @transform_1(%arg0: i32) -> (i32, i32) {
    %c0_i32 = arith.constant 0 : i32
    %c0_i32_0 = arith.constant 0 : i32
    %c0_i32_1 = arith.constant 0 : i32
    return %c0_i32, %c0_i32_0 : i32, i32
  }
  func.func @transform_2(%arg0: i32) -> (i32, i32, i32) {
    %c0_i32 = arith.constant 0 : i32
    %c0_i32_0 = arith.constant 0 : i32
    %c0_i32_1 = arith.constant 0 : i32
    %c0_i32_2 = arith.constant 0 : i32
    return %c0_i32, %c0_i32_0, %c0_i32_1 : i32, i32, i32
  }
  func.func @transform_3(%arg0: i32) -> (i32, i32) {
    %c0_i32 = arith.constant 0 : i32
    %c0_i32_0 = arith.constant 0 : i32
    %c0_i32_1 = arith.constant 0 : i32
    return %c0_i32, %c0_i32_0 : i32, i32
  }
  func.func @transform_4(%arg0: i32) -> (i32, i32, i32) {
    %c0_i32 = arith.constant 0 : i32
    %c0_i32_0 = arith.constant 0 : i32
    %c0_i32_1 = arith.constant 0 : i32
    return %c0_i32, %arg0, %c0_i32_0 : i32, i32, i32
  }
  func.func @transform_5(%arg0: i32) -> (i32, i32) {
    %c0_i32 = arith.constant 0 : i32
    %c0_i32_0 = arith.constant 0 : i32
    return %arg0, %c0_i32 : i32, i32
  }
}

</mosaic_0001>

<bundles_post_ra>
// kernel: tpu_custom_call.1
= control target key start
LH: loop header
LB: loop body
LE: loop exit
PB: predicated region body
PF: predicated region fallthrough
CT: control target
= control target key end

     0   :  { %10 = vsyncpa [#allocation3], 0  ;;  %s1091_s0 = inlined_call_operand.hbm [shape: bf16[16,64], index: 0, kind: input, shape index: {}]   ;;  %s1092_s1 = inlined_call_operand.hbm [shape: bf16[64,512], index: 1, kind: input, shape index: {}]   ;;  %s1093_s2 = inlined_call_operand.hbm [shape: bf16[1,128,512], index: 2, kind: input, shape index: {}]   ;;  %s1094_s3 = inlined_call_operand.hbm [shape: f32[2,512], index: 3, kind: input, shape index: {}]   ;;  %s1095_s4 = inlined_call_operand.hbm [shape: f32[1,16,128], index: 4, kind: input, shape index: {}]   ;;  %s1096_s5 = inlined_call_operand.hbm [shape: f32[16,128], index: 5, kind: output, shape index: {}]  }
   0x1   :  { %11 = vsyncpa [#allocation6], 0 }
   0x2   :  { %12 = vsyncpa [#allocation9], 0 }
   0x3   :  { %13 = vsyncpa [#allocation4], 0  ;;  %s1001_s18 = smov [#allocation5]  }
   0x4   :  { %s31_s19 = sshll.u32 %s1001_s18, 4  ;;  %s32_s19 = int_to_ptr.vmem [resolvable:$true] %s31_s19 }
   0x5   :  { %s881_s20 = scalar_lea.vmem %s32_s19, 2048  ;;  %p886_p1 = scmp.lt.s32.totalorder %s32_s19, %s32_s19 }
   0x6   :  { %p882_p0 = scmp.ne.s32.totalorder %s32_s19, %s881_s20  ;;  %p887_p2 = scmp.lt.s32.totalorder %s881_s20, %s881_s20 }
   0x8   :  { %p888_p3 = por %p887_p2, %p886_p1 }
   0xa   :  { %p889_p4 = pnand %p888_p3, %p882_p0 }
   0xc   :  { %892 = shalt.err (!%p889_p4)
}
   0xd   :  { %s1002_s21 = smov 256   ;;  %s1003_s22 = smov 16  }
   0xe   :  { %37 = dma.hbm_to_vmem [thread:$0]  %s1092_s1, 2048, %s32_s19, [#allocation6], %s1002_s21, %s1002_s21, %s1003_s22  }
   0xf   :  { %s1004_s25 = smov [#allocation8]   ;;  %s1005_s27 = smov [#allocation2]  }
  0x10   :  { %s56_s26 = sshll.u32 %s1004_s25, 4  ;;  %s19_s28 = sshll.u32 %s1005_s27, 4  ;;  %s57_s26 = int_to_ptr.vmem [resolvable:$true] %s56_s26  ;;  %s20_s28 = int_to_ptr.vmem [resolvable:$true] %s19_s28 }
  0x11   :  { %s901_s29 = scalar_lea.vmem %s57_s26, 128  ;;  %p906_p6 = scmp.lt.s32.totalorder %s57_s26, %s57_s26 }
  0x12   :  { %p902_p5 = scmp.ne.s32.totalorder %s57_s26, %s901_s29  ;;  %p907_p7 = scmp.lt.s32.totalorder %s901_s29, %s901_s29 }
  0x14   :  { %p908_p8 = por %p907_p7, %p906_p6 }
  0x16   :  { %p909_p9 = pnand %p908_p8, %p902_p5 }
  0x18   :  { %912 = shalt.err (!%p909_p9)
}
  0x19   :  { %59 = dma.hbm_to_vmem [thread:$0]  %s1094_s3, 128, %s57_s26, [#allocation9]  }
  0x1a   :  { %s921_s7 = scalar_lea.vmem %s20_s28, 128  ;;  %p926_p11 = scmp.lt.s32.totalorder %s20_s28, %s20_s28 }
  0x1b   :  { %p922_p10 = scmp.ne.s32.totalorder %s20_s28, %s921_s7  ;;  %p927_p12 = scmp.lt.s32.totalorder %s921_s7, %s921_s7 }
  0x1d   :  { %p928_p13 = por %p927_p12, %p926_p11 }
  0x1f   :  { %p929_p0 = pnand %p928_p13, %p922_p10 }
  0x21   :  { %932 = shalt.err (!%p929_p0)
}
  0x22   :  { %s1006_s1 = smov 64   ;;  %s1007_s8 = smov 4  }
  0x23   :  { %25 = dma.hbm_to_vmem [thread:$0]  %s1091_s0, 128, %s20_s28, [#allocation3], %s1006_s1, %s1006_s1, %s1007_s8  }
  0x24   :  { %s1008_s11 = smov [#allocation7]   ;;  %s1009_s13 = smov [#allocation10]  }
  0x25   :  { %s43_s12 = sshll.u32 %s1008_s11, 4  ;;  %s65_s14 = sshll.u32 %s1009_s13, 4  ;;  %s44_s12 = int_to_ptr.vmem [resolvable:$true] %s43_s12  ;;  %s66_s14 = int_to_ptr.vmem [resolvable:$true] %s65_s14 }
  0x26   :  { %s941_s3 = scalar_lea.vmem %s44_s12, 4096  ;;  %p946_p2 = scmp.lt.s32.totalorder %s44_s12, %s44_s12 }
  0x27   :  { %p942_p1 = scmp.ne.s32.totalorder %s44_s12, %s941_s3  ;;  %p947_p3 = scmp.lt.s32.totalorder %s941_s3, %s941_s3 }
  0x29   :  { %p948_p4 = por %p947_p3, %p946_p2 }
  0x2b   :  { %p949_p5 = pnand %p948_p4, %p942_p1 }
  0x2d   :  { %952 = shalt.err (!%p949_p5)
}
  0x2e   :  { %49 = dma.hbm_to_vmem [thread:$0]  %s1093_s2, 4096, %s44_s12, [#allocation6], %s1002_s21, %s1002_s21, %s1003_s22  }
  0x2f   :  { %s961_s0 = scalar_lea.vmem %s66_s14, 256  ;;  %p966_p7 = scmp.lt.s32.totalorder %s66_s14, %s66_s14 }
  0x30   :  { %p962_p6 = scmp.ne.s32.totalorder %s66_s14, %s961_s0  ;;  %p967_p8 = scmp.lt.s32.totalorder %s961_s0, %s961_s0 }
  0x32   :  { %p968_p9 = por %p967_p8, %p966_p7 }
  0x34   :  { %p969_p10 = pnand %p968_p9, %p962_p6 }
  0x36   :  { %972 = shalt.err (!%p969_p10)
}
  0x37   :  { %s1010_s17 = smov 128   ;;  %s1011_s18 = smov 8  }
  0x38   :  { %71 = dma.hbm_to_vmem [thread:$0]  %s1095_s4, 256, %s66_s14, [#allocation9], %s1010_s17, %s1010_s17, %s1011_s18  }
  0x39   :  { %993 = dma.done.wait [#allocation3], 128  }
  0x3a   :  { %994 = vsyncadd [#allocation3], 4294967168 }
  0x3b   :  { %995 = dma.done.wait [#allocation6], 6144  }
  0x3c   :  { %996 = vsyncadd [#allocation6], 4294961152 }
  0x3d   :  { %997 = dma.done.wait [#allocation9], 384  }
  0x3e   :  { %998 = vsyncadd [#allocation9], 4294966912  ;;  %v1012_v0 = vmov 0   ;;  %v752_v1 = vld [vmem:[#allocation5 + $0x64] ss:$16 sps:$4 sm:$0xff]   ;;  %v770_v15 = vld [vmem:[#allocation2] sm:$0xff]   ;;  %v108_v50 = vlaneseq }
  0x3f   :  { %244 = vmatprep.mubr.bf16.mxu0 %v1012_v0  ;;  %285 = vmatprep.mubr.bf16.mxu1 %v1012_v0  ;;  %v754_v2 = vld [vmem:[#allocation5 + $0x60] ss:$16 sps:$4 sm:$0xff]   ;;  %v755_v3 = vld [vmem:[#allocation5 + $0x44] ss:$16 sps:$4 sm:$0xff]   ;;  %v760_v6 = vld [vmem:[#allocation5 + $0x6c] ss:$16 sps:$4 sm:$0xff]  }
  0x40   :  { %220 = vmatprep.subr.bf16.mxu0 %v752_v1  ;;  %v757_v4 = vld [vmem:[#allocation5 + $0x40] ss:$16 sps:$4 sm:$0xff]   ;;  %v758_v5 = vld [vmem:[#allocation5 + $0x24] ss:$16 sps:$4 sm:$0xff]   ;;  %v763_v7 = vld [vmem:[#allocation5 + $0x68] ss:$16 sps:$4 sm:$0xff]   ;;  %261 = vmatprep.subr.bf16.mxu1 %v760_v6 }
  0x41   :  { %221 = vmatpush1.bf16.msra.mxu0 %v754_v2  ;;  %v762_v8 = vld [vmem:[#allocation5 + $0x20] ss:$16 sps:$4 sm:$0xff]   ;;  %262 = vmatpush1.bf16.msra.mxu1 %v763_v7  ;;  %v766_v9 = vld [vmem:[#allocation5 + $0x4c] ss:$16 sps:$4 sm:$0xff]   ;;  %v769_v10 = vld [vmem:[#allocation5 + $0x48] ss:$16 sps:$4 sm:$0xff]  }
  0x42   :  { %222 = vmatprep.subr.bf16.mxu0 %v755_v3  ;;  %v764_v11 = vld [vmem:[#allocation5 + $0x4] ss:$16 sps:$4 sm:$0xff]   ;;  %263 = vmatprep.subr.bf16.mxu1 %v766_v9  ;;  %v771_v12 = vld [vmem:[#allocation5 + $0x2c] ss:$16 sps:$4 sm:$0xff]   ;;  %v768_v13 = vld [vmem:[#allocation5] ss:$16 sps:$4 sm:$0xff]  }
  0x43   :  { %v773_v14 = vld [vmem:[#allocation5 + $0x28] ss:$16 sps:$4 sm:$0xff]   ;;  %v774_v16 = vld [vmem:[#allocation5 + $0xc] ss:$16 sps:$4 sm:$0xff]   ;;  %vm208_vm0 = vcmask 523264   ;;  %v1068_v51 = vshrl.u32 %v108_v50, 7 }
  0x44   :  { %v776_v17 = vld [vmem:[#allocation5 + $0x8] ss:$16 sps:$4 sm:$0xff]   ;;  %v779_v18 = vld [vmem:[#allocation7 + $0xe4] ss:$16 sps:$4 sm:$0xff]   ;;  %v782_v19 = vld [vmem:[#allocation7 + $0xec] ss:$16 sps:$4 sm:$0xff]  }
  0x45   :  { %223 = vmatpush1.bf16.msra.mxu0 %v757_v4  ;;  %264 = vmatpush1.bf16.msra.mxu1 %v769_v10  ;;  %v777_v20 = vld [vmem:[#allocation7 + $0xe0] ss:$16 sps:$4 sm:$0xff]   ;;  %v780_v21 = vld [vmem:[#allocation7 + $0xe8] ss:$16 sps:$4 sm:$0xff]   ;;  %v785_v22 = vld [vmem:[#allocation7 + $0xc4] ss:$16 sps:$4 sm:$0xff]  }
  0x46   :  { %224 = vmatprep.subr.bf16.mxu0 %v758_v5  ;;  %265 = vmatprep.subr.bf16.mxu1 %v771_v12  ;;  %v788_v23 = vld [vmem:[#allocation7 + $0xcc] ss:$16 sps:$4 sm:$0xff]   ;;  %v783_v24 = vld [vmem:[#allocation7 + $0xc0] ss:$16 sps:$4 sm:$0xff]   ;;  %v786_v25 = vld [vmem:[#allocation7 + $0xc8] ss:$16 sps:$4 sm:$0xff]  }
  0x47   :  { %v791_v26 = vld [vmem:[#allocation7 + $0xa4] ss:$16 sps:$4 sm:$0xff]   ;;  %v794_v27 = vld [vmem:[#allocation7 + $0xac] ss:$16 sps:$4 sm:$0xff]   ;;  %v789_v28 = vld [vmem:[#allocation7 + $0xa0] ss:$16 sps:$4 sm:$0xff]  }
  0x48   :  { %v792_v29 = vld [vmem:[#allocation7 + $0xa8] ss:$16 sps:$4 sm:$0xff]   ;;  %v797_v30 = vld [vmem:[#allocation7 + $0x84] ss:$16 sps:$4 sm:$0xff]   ;;  %v800_v31 = vld [vmem:[#allocation7 + $0x8c] ss:$16 sps:$4 sm:$0xff]  }
  0x49   :  { %225 = vmatpush1.bf16.msra.mxu0 %v762_v8  ;;  %266 = vmatpush1.bf16.msra.mxu1 %v773_v14  ;;  %v795_v32 = vld [vmem:[#allocation7 + $0x80] ss:$16 sps:$4 sm:$0xff]   ;;  %v798_v33 = vld [vmem:[#allocation7 + $0x88] ss:$16 sps:$4 sm:$0xff]   ;;  %v803_v34 = vld [vmem:[#allocation7 + $0x64] ss:$16 sps:$4 sm:$0xff]  }
  0x4a   :  { %226 = vmatprep.subr.bf16.mxu0 %v764_v11  ;;  %267 = vmatprep.subr.bf16.mxu1 %v774_v16  ;;  %v801_v35 = vld [vmem:[#allocation7 + $0x60] ss:$16 sps:$4 sm:$0xff]   ;;  %v804_v36 = vld [vmem:[#allocation7 + $0x68] ss:$16 sps:$4 sm:$0xff]   ;;  %v806_v37 = vld [vmem:[#allocation7 + $0x6c] ss:$16 sps:$4 sm:$0xff]  }
  0x4b   :  { %v809_v38 = vld [vmem:[#allocation7 + $0x44] ss:$16 sps:$4 sm:$0xff]   ;;  %v812_v39 = vld [vmem:[#allocation7 + $0x4c] ss:$16 sps:$4 sm:$0xff]   ;;  %v807_v40 = vld [vmem:[#allocation7 + $0x40] ss:$16 sps:$4 sm:$0xff]  }
  0x4c   :  { %v810_v41 = vld [vmem:[#allocation7 + $0x48] ss:$16 sps:$4 sm:$0xff]   ;;  %v815_v42 = vld [vmem:[#allocation7 + $0x24] ss:$16 sps:$4 sm:$0xff]   ;;  %v818_v43 = vld [vmem:[#allocation7 + $0x2c] ss:$16 sps:$4 sm:$0xff]  }
  0x4d   :  { %227 = vmatpush1.bf16.msra.mxu0 %v768_v13  ;;  %268 = vmatpush1.bf16.msra.mxu1 %v776_v17  ;;  %v813_v44 = vld [vmem:[#allocation7 + $0x20] ss:$16 sps:$4 sm:$0xff]   ;;  %v816_v45 = vld [vmem:[#allocation7 + $0x28] ss:$16 sps:$4 sm:$0xff]   ;;  %v821_v46 = vld [vmem:[#allocation7 + $0x4] ss:$16 sps:$4 sm:$0xff]  }
  0x4e   :  { %543 = vmatprep.subr.bf16.mxu0 %v779_v18  ;;  %584 = vmatprep.subr.bf16.mxu1 %v782_v19  ;;  %v824_v47 = vld [vmem:[#allocation7 + $0xc] ss:$16 sps:$4 sm:$0xff]   ;;  %v819_v48 = vld [vmem:[#allocation7] ss:$16 sps:$4 sm:$0xff]   ;;  %v822_v49 = vld [vmem:[#allocation7 + $0x8] ss:$16 sps:$4 sm:$0xff]  }
  0x4f   :  { %v110_v52 = vsub.s32 0, %v1068_v51  ;;  %v106_v53 = vld [vmem:[#allocation8] ss:$2 sm:$0xf]  ;;  %v118_v59 = vsub.s32 3, %v1068_v51  ;;  %s1013_s2 = smov [#allocation11]  }
  0x50   :  { %697 = vmatmul.mubr.msk.bf16.vlgmr.msra.gmra.mxu0 %vm208_vm0, %v770_v15  ;;  %698 = vmatmul.mubr.msk.bf16.vlgmr.msra.gmra.mxu1 %vm208_vm0, %v770_v15  ;;  %s666_s4 = sshll.u32 %s1013_s2, 4  ;;  %s667_s4 = int_to_ptr.vmem [resolvable:$true] %s666_s4 }
  0x51   :  { %575 = vmatprep.mubr.bf16.mxu0 %v1012_v0  ;;  %616 = vmatprep.mubr.bf16.mxu1 %v1012_v0  ;;  %v111_v54 = vrot.slane %v106_v53, %v110_v52  ;;  %v114_v0 = vsub.s32 2, %v1068_v51  ;;  %v119_v3 = vrot.slane %v106_v53, %v118_v59  ;;  %s973_s21 = scalar_lea.vmem %s667_s4, 256  ;;  %p978_p12 = scmp.lt.s32.totalorder %s667_s4, %s667_s4 }
  0x52   :  { %544 = vmatpush1.bf16.msra.mxu0 %v777_v20  ;;  %585 = vmatpush1.bf16.msra.mxu1 %v780_v21  ;;  %p974_p11 = scmp.ne.s32.totalorder %s667_s4, %s973_s21  ;;  %p979_p13 = scmp.lt.s32.totalorder %s973_s21, %s973_s21 }
  0x53   :  { %545 = vmatprep.subr.bf16.mxu0 %v785_v22  ;;  %586 = vmatprep.subr.bf16.mxu1 %v788_v23  ;;  %v115_v5 = vrot.slane %v106_v53, %v114_v0 }
  0x54   :  { %p980_p0 = por %p979_p13, %p978_p12 }
  0x56   :  { %546 = vmatpush1.bf16.msra.mxu0 %v783_v24  ;;  %587 = vmatpush1.bf16.msra.mxu1 %v786_v25  ;;  %p981_p1 = pnand %p980_p0, %p974_p11 }
  0x57   :  { %547 = vmatprep.subr.bf16.mxu0 %v791_v26  ;;  %588 = vmatprep.subr.bf16.mxu1 %v794_v27 }
  0x5a   :  { %548 = vmatpush1.bf16.msra.mxu0 %v789_v28  ;;  %589 = vmatpush1.bf16.msra.mxu1 %v792_v29 }
  0x5b   :  { %549 = vmatprep.subr.bf16.mxu0 %v797_v30  ;;  %590 = vmatprep.subr.bf16.mxu1 %v800_v31 }
  0x5e   :  { %550 = vmatpush1.bf16.msra.mxu0 %v795_v32  ;;  %591 = vmatpush1.bf16.msra.mxu1 %v798_v33  ;;  %v328_v32 = vld [vmem:[#allocation10] sm:$0xff]  ;;  %v329_v33 = vld [vmem:[#allocation10 + $0x8] sm:$0xff] }
  0x5f   :  { %551 = vmatprep.subr.bf16.mxu0 %v803_v34  ;;  %592 = vmatprep.subr.bf16.mxu1 %v806_v37 }
  0x62   :  { %552 = vmatpush1.bf16.msra.mxu0 %v801_v35  ;;  %593 = vmatpush1.bf16.msra.mxu1 %v804_v36 }
  0x63   :  { %553 = vmatprep.subr.bf16.mxu0 %v809_v38  ;;  %594 = vmatprep.subr.bf16.mxu1 %v812_v39  ;;  %v366_v38 = vld [vmem:[#allocation8 + $0x1] ss:$2 sm:$0xf] }
  0x64   :  { %v371_v39 = vrot.slane %v366_v38, %v110_v52  ;;  %v375_v52 = vrot.slane %v366_v38, %v114_v0 }
  0x66   :  { %554 = vmatpush1.bf16.msra.mxu0 %v807_v40  ;;  %595 = vmatpush1.bf16.msra.mxu1 %v810_v41 }
  0x67   :  { %555 = vmatprep.subr.bf16.mxu0 %v815_v42  ;;  %596 = vmatprep.subr.bf16.mxu1 %v818_v43 }
  0x6a   :  { %556 = vmatpush1.bf16.msra.mxu0 %v813_v44  ;;  %597 = vmatpush1.bf16.msra.mxu1 %v816_v45 }
  0x6b   :  { %557 = vmatprep.subr.bf16.mxu0 %v821_v46  ;;  %598 = vmatprep.subr.bf16.mxu1 %v824_v47  ;;  %v379_v46 = vrot.slane %v366_v38, %v118_v59 }
  0x6e   :  { %558 = vmatpush1.bf16.msra.mxu0 %v819_v48  ;;  %599 = vmatpush1.bf16.msra.mxu1 %v822_v49 }
 0x110   :  { %v246_v55 = vpop.f32.mrf.mxu0  ;;  %v287_v61 = vpop.f32.mrf.mxu1 }
 0x111   :  { %v247_v56 = vadd.f32 %v246_v55, %v111_v54  ;;  %v288_v9 = vadd.f32 %v287_v61, %v115_v5 }
 0x112   :  { %v248_v57 = vpop.f32.mrf.mxu0  ;;  %v289_v1 = vpop.f32.mrf.mxu1 }
 0x113   :  { %v699_v58 = vmul.f32 -1.442695, %v247_v56  ;;  %v290_v7 = vadd.f32 %v289_v1, %v119_v3 }
 0x114   :  { %v249_v60 = vpop.f32.mrf.mxu0  ;;  %v291_v4 = vpop.f32.mrf.mxu1 }
 0x115   :  { %825 = vpow2.f32 %v699_v58  ;;  %v250_v62 = vadd.f32 %v249_v60, %v111_v54  ;;  %v701_v10 = vmul.f32 -1.442695, %v290_v7  ;;  %v292_v14 = vadd.f32 %v291_v4, %v115_v5 }
 0x116   :  { %v251_v63 = vpop.f32.mrf.mxu0  ;;  %v293_v6 = vpop.f32.mrf.mxu1 }
 0x117   :  { %v700_v2 = vmul.f32 -1.442695, %v250_v62  ;;  %v294_v8 = vadd.f32 %v293_v6, %v119_v3 }
 0x119   :  { %827 = vpow2.f32 %v700_v2  ;;  %v702_v11 = vmul.f32 -1.442695, %v294_v8 }
 0x11a   :  { %829 = vtanh.f32 %v288_v9 }
 0x11b   :  { %831 = vpow2.f32 %v701_v10 }
 0x11c   :  { %833 = vpow2.f32 %v702_v11 }
 0x122   :  { %v826_v12 = vpop.eup %825 }
 0x123   :  { %v302_v13 = vadd.f32 1.0, %v826_v12 }
 0x125   :  { %835 = vrcp.f32 %v302_v13 }
 0x126   :  { %v828_v15 = vpop.eup %827  ;;  %837 = vtanh.f32 %v292_v14 }
 0x127   :  { %v303_v16 = vadd.f32 1.0, %v828_v15  ;;  %v830_v17 = vpop.eup %829 }
 0x128   :  { %v832_v18 = vpop.eup %831 }
 0x129   :  { %839 = vrcp.f32 %v303_v16  ;;  %v834_v19 = vpop.eup %833  ;;  %v316_v22 = vadd.f32 1.0, %v832_v18 }
 0x12a   :  { %v317_v23 = vadd.f32 1.0, %v834_v19 }
 0x132   :  { %v836_v20 = vpop.eup %835 }
 0x133   :  { %v322_v21 = vmul.f32 %v836_v20, %v830_v17  ;;  %v838_v24 = vpop.eup %837 }
 0x135   :  { %841 = vtanh.f32 %v322_v21 }
 0x136   :  { %v840_v25 = vpop.eup %839  ;;  %843 = vrcp.f32 %v316_v22 }
 0x137   :  { %v323_v26 = vmul.f32 %v840_v25, %v838_v24  ;;  %845 = vrcp.f32 %v317_v23 }
 0x139   :  { %847 = vtanh.f32 %v323_v26 }
 0x142   :  { %v842_v27 = vpop.eup %841 }
 0x143   :  { %v844_v28 = vpop.eup %843 }
 0x144   :  { %v846_v29 = vpop.eup %845  ;;  %v326_v30 = vmul.f32 %v844_v28, %v842_v27 }
 0x146   :  { %v848_v31 = vpop.eup %847  ;;  %v330_v35 = vmul.f32 %v328_v32, %v326_v30 }
 0x147   :  { %v327_v34 = vmul.f32 %v848_v31, %v846_v29 }
 0x149   :  { %v331_v36 = vmul.f32 %v329_v33, %v327_v34 }
 0x14b   :  { %v332_v37 = vpack.c.bf16 %v331_v36, %v330_v35 }
 0x14d   :  { %576 = vmatmul.mubr.bf16.vlgmr.msra.gmra.mxu0 %v332_v37  ;;  %617 = vmatmul.mubr.bf16.vlgmr.msra.gmra.mxu1 %v332_v37 }
 0x20d   :  { %v577_v40 = vpop.f32.mrf.mxu0  ;;  %v618_v41 = vpop.f32.mrf.mxu1 }
 0x20e   :  { %v578_v42 = vadd.f32 %v577_v40, %v371_v39  ;;  %v619_v58 = vadd.f32 %v618_v41, %v375_v52 }
 0x20f   :  { %v579_v43 = vpop.f32.mrf.mxu0  ;;  %v620_v44 = vpop.f32.mrf.mxu1 }
 0x210   :  { %v735_v45 = vmul.f32 -1.442695, %v578_v42  ;;  %v621_v54 = vadd.f32 %v620_v44, %v379_v46 }
 0x211   :  { %v580_v47 = vpop.f32.mrf.mxu0  ;;  %v622_v49 = vpop.f32.mrf.mxu1 }
 0x212   :  { %849 = vpow2.f32 %v735_v45  ;;  %v581_v48 = vadd.f32 %v580_v47, %v371_v39  ;;  %v737_v56 = vmul.f32 -1.442695, %v621_v54  ;;  %v623_v59 = vadd.f32 %v622_v49, %v375_v52 }
 0x213   :  { %v582_v50 = vpop.f32.mrf.mxu0  ;;  %v624_v55 = vpop.f32.mrf.mxu1 }
 0x214   :  { %v736_v53 = vmul.f32 -1.442695, %v581_v48  ;;  %v625_v57 = vadd.f32 %v624_v55, %v379_v46 }
 0x216   :  { %851 = vpow2.f32 %v736_v53  ;;  %v738_v60 = vmul.f32 -1.442695, %v625_v57 }
 0x217   :  { %853 = vpow2.f32 %v737_v56 }
 0x218   :  { %855 = vtanh.f32 %v619_v58 }
 0x219   :  { %857 = vpow2.f32 %v738_v60 }
 0x21f   :  { %v850_v61 = vpop.eup %849 }
 0x220   :  { %v633_v62 = vadd.f32 1.0, %v850_v61 }
 0x222   :  { %859 = vrcp.f32 %v633_v62 }
 0x223   :  { %v852_v63 = vpop.eup %851  ;;  %861 = vtanh.f32 %v623_v59 }
 0x224   :  { %v634_v1 = vadd.f32 1.0, %v852_v63  ;;  %v854_v2 = vpop.eup %853 }
 0x225   :  { %v856_v3 = vpop.eup %855  ;;  %v647_v4 = vadd.f32 1.0, %v854_v2 }
 0x226   :  { %863 = vrcp.f32 %v634_v1  ;;  %v858_v51 = vpop.eup %857 }
 0x227   :  { %865 = vrcp.f32 %v647_v4  ;;  %v648_v6 = vadd.f32 1.0, %v858_v51 }
 0x22f   :  { %v860_v0 = vpop.eup %859 }
 0x230   :  { %v653_v5 = vmul.f32 %v860_v0, %v856_v3  ;;  %v862_v7 = vpop.eup %861 }
 0x232   :  { %867 = vtanh.f32 %v653_v5 }
 0x233   :  { %v864_v8 = vpop.eup %863  ;;  %869 = vrcp.f32 %v648_v6 }
 0x234   :  { %v654_v9 = vmul.f32 %v864_v8, %v862_v7  ;;  %v866_v10 = vpop.eup %865 }
 0x236   :  { %871 = vtanh.f32 %v654_v9 }
 0x23f   :  { %v868_v11 = vpop.eup %867 }
 0x240   :  { %v657_v12 = vmul.f32 %v868_v11, %v866_v10  ;;  %v870_v13 = vpop.eup %869 }
 0x242   :  { %659 = vst [vmem:[#allocation11] sm:$0xff] %v657_v12 }
 0x243   :  { %v872_v14 = vpop.eup %871 }
 0x244   :  { %v658_v15 = vmul.f32 %v872_v14, %v870_v13 }
 0x246   :  { %660 = vst [vmem:[#allocation11 + $0x8] sm:$0xff] %v658_v15 }
 0x247   :  { %984 = shalt.err (!%p981_p1)
}
 0x248   :  { %672 = dma.vmem_to_hbm [thread:$0]  %s667_s4, 256, %s1096_s5, [#allocation4], %s1010_s17, %s1010_s17, %s1011_s18  }
 0x249   :  { %999 = dma.done.wait [#allocation4], 256  }
 0x24a   :  { %1000 = vsyncadd [#allocation4], 4294967040 }
 0x24b   :  { %676 = vsyncpa [#allocation3], 1 }
 0x24c   :  { %677 = vsyncpa [#allocation6], 1 }
 0x24d   :  { %678 = vsyncpa [#allocation9], 1 }
 0x24e   :  { %679 = vsyncpa [#allocation4], 1 }

</bundles_post_ra>
